<compile_context>
chip_gen: v5e
topology: v5e:2x2
jax: 0.10.0
libtpu: 0.0.40
codegen_flags: <defaults>
</compile_context>

<pallas_src>
import math

import jax
import jax.numpy as jnp
from jax import lax
from jax.experimental import pallas as pl
from jax.experimental.pallas import tpu as pltpu


def _round_up(x, m):
    return ((x + m - 1) // m) * m


# ------------------------------ Pallas kernels -------------------------------

def _noisy_linear_train_kernel(x_ref, wmu_ref, wsig_ref, ein_ref, eout_ref,
                               bmu_ref, bsig_ref, beps_ref, o_ref, acc_ref):
    k = pl.program_id(2)

    @pl.when(k == 0)
    def _init():
        acc_ref[...] = jnp.zeros_like(acc_ref)

    x = x_ref[...]                                            # (tb, tk), stream dtype

    # mu term: contract the In axes of (tb, tk) x and (tn, tk) Wmu directly -> (tb, tn)
    mu_part = lax.dot_general(
        x, wmu_ref[...],
        dimension_numbers=(((1,), (1,)), ((), ())),
        preferred_element_type=jnp.float32)

    # sigma term of the factorized noise:
    #   (x * eps_in) @ Wsigma.T, scaled per output column by eps_out.
    # The only VALU work is O(tb*tk) on activations (tiny) + an O(tb*tn) scale,
    # instead of an O(tn*tk) per-tile weight combine.
    xn = (x.astype(jnp.float32) * ein_ref[...]).astype(x.dtype)        # (tb, tk)
    sig_part = lax.dot_general(
        xn, wsig_ref[...],
        dimension_numbers=(((1,), (1,)), ((), ())),
        preferred_element_type=jnp.float32)

    acc_ref[...] += mu_part + sig_part * eout_ref[...]        # eout: (1, tn) f32 row

    @pl.when(k == pl.num_programs(2) - 1)
    def _finalize():
        b = bmu_ref[...] + bsig_ref[...] * beps_ref[...]      # (1, tn) f32
        o_ref[...] = (acc_ref[...] + b).astype(o_ref.dtype)


def _noisy_linear_eval_kernel(x_ref, wmu_ref, bmu_ref, o_ref, acc_ref):
    k = pl.program_id(2)

    @pl.when(k == 0)
    def _init():
        acc_ref[...] = jnp.zeros_like(acc_ref)

    acc_ref[...] += lax.dot_general(
        x_ref[...], wmu_ref[...],
        dimension_numbers=(((1,), (1,)), ((), ())),
        preferred_element_type=jnp.float32)

    @pl.when(k == pl.num_programs(2) - 1)
    def _finalize():
        o_ref[...] = (acc_ref[...] + bmu_ref[...]).astype(o_ref.dtype)


# ------------------------------ Python wrapper --------------------------------

def noisy_linear_forward(x, params, training=True, *, tb=512, tn=512, tk=1024):
    """x: (B, In). params: dict from init_noisy_linear. Returns (B, Out)."""
    B, In = x.shape
    Out, _ = params["weight_mu"].shape
    out_dtype = x.dtype
    stream_dtype = params["weight_mu"].dtype       # bf16 by default (halves weight HBM)

    # --- pad to hardware tiles ------------------------------------------------
    # B -> multiple of 8 (sublane), In/Out -> multiple of 128 (lane), then up to the
    # chosen tile so the grid divides and every DMA/store is a full unmasked vreg.
    B_p = _round_up(B, 8)
    In_p = _round_up(In, 128)
    Out_p = _round_up(Out, 128)

    # Batch tiling (parallel axis): one tile when small, 256-row tiles when large, so
    # the x block + f32 accumulator never blow past v7x's smaller VMEM.
    if B_p <= tb:
        tb = B_p
    else:
        tb = 256
        B_p = _round_up(B_p, tb)

    # K tiling (reduction axis, innermost).
    tk = min(tk, In_p)
    In_p = _round_up(In_p, tk)

    # N tiling: cap tn so there are >=2 parallel N tiles whenever Out_p >= 256
    # (v7x has 2 TensorCores; a single N tile leaves one idle).
    if Out_p >= 256:
        tn_cap = max(128, ((Out_p // 2) // 128) * 128)
    else:
        tn_cap = Out_p
    tn = min(tn, tn_cap)
    Out_p = _round_up(Out_p, tn)

    grid = (B_p // tb, Out_p // tn, In_p // tk)   # (B-tiles, N-tiles, K-tiles)

    def pad2(a, rows, cols, dtype=None):
        if dtype is not None:
            a = a.astype(dtype)
        pr, pc = rows - a.shape[0], cols - a.shape[1]
        return a if (pr == 0 and pc == 0) else jnp.pad(a, ((0, pr), (0, pc)))

    x_p = pad2(x, B_p, In_p, stream_dtype)                      # bf16 x for the MXU
    wmu_p = pad2(params["weight_mu"], Out_p, In_p)              # already stream_dtype
    bmu_p = pad2(params["bias_mu"].reshape(1, Out).astype(jnp.float32), 1, Out_p)

    # --- explicit scoped-VMEM budget (v5e default is only 16 MiB) --------------
    itm = lambda dt: jnp.dtype(dt).itemsize
    est = (2 * tb * tk * itm(stream_dtype)            # x, double-buffered
           + 2 * 2 * tn * tk * itm(stream_dtype)      # Wmu + Wsigma, double-buffered
           + 2 * (tk + 4 * tn) * 4                    # eps_in row + 4 bias/eps rows
           + tb * tn * 4                              # f32 accumulator
           + 2 * tb * tn * itm(out_dtype))            # output, double-buffered
    vmem_limit = int(min(max(2 * est, 32 * 1024 * 1024), 64 * 1024 * 1024))

    compiler_params = pltpu.CompilerParams(
        dimension_semantics=("parallel", "parallel", "arbitrary"),
        vmem_limit_bytes=vmem_limit)

    x_spec = pl.BlockSpec((tb, tk), lambda b, n, k: (b, k))
    w_spec = pl.BlockSpec((tn, tk), lambda b, n, k: (n, k))
    ein_spec = pl.BlockSpec((1, tk), lambda b, n, k: (0, k))
    row_spec = pl.BlockSpec((1, tn), lambda b, n, k: (0, n))
    out_spec = pl.BlockSpec((tb, tn), lambda b, n, k: (b, n))
    scratch = [pltpu.VMEM((tb, tn), jnp.float32)]
    out_shape = jax.ShapeDtypeStruct((B_p, Out_p), out_dtype)

    if training:
        wsig_p = pad2(params["weight_sigma"], Out_p, In_p)
        ein_p = pad2(params["weight_eps_in"].reshape(1, In).astype(jnp.float32), 1, In_p)
        eout_p = pad2(params["weight_eps_out"].reshape(1, Out).astype(jnp.float32), 1, Out_p)
        bsig_p = pad2(params["bias_sigma"].reshape(1, Out).astype(jnp.float32), 1, Out_p)
        beps_p = pad2(params["bias_epsilon"].reshape(1, Out).astype(jnp.float32), 1, Out_p)

        y_p = pl.pallas_call(
            _noisy_linear_train_kernel,
            out_shape=out_shape,
            grid_spec=pltpu.PrefetchScalarGridSpec(
                num_scalar_prefetch=0,
                grid=grid,
                in_specs=[
                    x_spec,     # x
                    w_spec,     # weight_mu
                    w_spec,     # weight_sigma
                    ein_spec,   # eps_in row (f32)
                    row_spec,   # eps_out row (f32)
                    row_spec,   # bias_mu
                    row_spec,   # bias_sigma
                    row_spec,   # bias_epsilon
                ],
                out_specs=out_spec,
                scratch_shapes=scratch),
            compiler_params=compiler_params,
        )(x_p, wmu_p, wsig_p, ein_p, eout_p, bmu_p, bsig_p, beps_p)
    else:
        y_p = pl.pallas_call(
            _noisy_linear_eval_kernel,
            out_shape=out_shape,
            grid_spec=pltpu.PrefetchScalarGridSpec(
                num_scalar_prefetch=0,
                grid=grid,
                in_specs=[x_spec, w_spec, row_spec],
                out_specs=out_spec,
                scratch_shapes=scratch),
            compiler_params=compiler_params,
        )(x_p, wmu_p, bmu_p)

    return y_p[:B, :Out]


# -------------------------- deterministic param init --------------------------

def _scale_noise(key, size):
    # x.sign() * x.abs().sqrt()  with x ~ N(0, 1)
    x = jax.random.normal(key, (size,), dtype=jnp.float32)
    return jnp.sign(x) * jnp.sqrt(jnp.abs(x))


def init_noisy_linear(key, in_features, out_features, std_init=0.5,
                      param_dtype=jnp.bfloat16):
    k_wmu, k_bmu, k_ein, k_eout = jax.random.split(key, 4)
    mu_range = 1.0 / math.sqrt(in_features)

    weight_mu = jax.random.uniform(
        k_wmu, (out_features, in_features), jnp.float32, -mu_range, mu_range)
    weight_sigma = jnp.full((out_features, in_features),
                            std_init / math.sqrt(in_features), jnp.float32)
    bias_mu = jax.random.uniform(
        k_bmu, (out_features,), jnp.float32, -mu_range, mu_range)
    bias_sigma = jnp.full((out_features,),
                          std_init / math.sqrt(out_features), jnp.float32)

    # reset_noise(): factorized Gaussian noise; kept FACTORIZED — the kernel applies
    # eps_in to the activations and eps_out to the sigma-matmul output instead of ever
    # materializing the (Out, In) outer product.
    eps_in = _scale_noise(k_ein, in_features)
    eps_out = _scale_noise(k_eout, out_features)

    return {
        # Weights stored in bf16: the kernel is HBM-bandwidth-bound on these streams.
        "weight_mu": weight_mu.astype(param_dtype),
        "weight_sigma": weight_sigma.astype(param_dtype),
        "weight_eps_in": eps_in,      # (In,)  f32
        "weight_eps_out": eps_out,    # (Out,) f32
        "bias_mu": bias_mu,           # f32
        "bias_sigma": bias_sigma,     # f32
        "bias_epsilon": eps_out,      # f32
    }


# ----------------------------------- main --------------------------------------

def _reference(x, p, training):
    wmu = p["weight_mu"].astype(jnp.float32)
    bmu = p["bias_mu"].astype(jnp.float32)
    if training:
        w_eps = jnp.outer(p["weight_eps_out"], p["weight_eps_in"])
        w = wmu + p["weight_sigma"].astype(jnp.float32) * w_eps
        b = bmu + p["bias_sigma"] * p["bias_epsilon"]
    else:
        w, b = wmu, bmu
    return x @ w.T + b


if __name__ == "__main__":
    root = jax.random.PRNGKey(0)

    # (B, In, Out): the toy DQN-head shape, a non-aligned multi-tile shape that
    # exercises padding + the (B,N,K) grid, and one shape with >=2 parallel N tiles.
    for idx, (B, In, Out) in enumerate([(2, 32, 64), (3, 160, 192), (4, 512, 256)]):
        k_params, k_x = jax.random.split(jax.random.fold_in(root, idx))
        params = init_noisy_linear(k_params, In, Out, std_init=0.5)
        x = jax.random.normal(k_x, (B, In), dtype=jnp.float32)

        y_train = jax.block_until_ready(noisy_linear_forward(x, params, training=True))
        y_eval = jax.block_until_ready(noisy_linear_forward(x, params, training=False))

        ref_train = _reference(x, params, training=True)
        ref_eval = _reference(x, params, training=False)

        assert y_train.shape == (B, Out) and y_eval.shape == (B, Out)
        # bf16 weight streaming + bf16 x on the MXU (f32 accumulation): loosened tolerance.
        assert jnp.allclose(y_train, ref_train, atol=2e-2, rtol=2e-2), \
            f"train mismatch at shape {(B, In, Out)}"
        assert jnp.allclose(y_eval, ref_eval, atol=2e-2, rtol=2e-2), \
            f"eval mismatch at shape {(B, In, Out)}"

    print("KERNEL_OK")
</pallas_src>

<mosaic_0001>
module attributes {stable_mosaic.version = 11 : i64} {
  func.func @_noisy_linear_train_kernel(%arg0: i32, %arg1: i32, %arg2: i32, %arg3: memref<8x128xbf16, #tpu.memory_space<vmem>>, %arg4: memref<128x128xbf16, #tpu.memory_space<vmem>>, %arg5: memref<128x128xbf16, #tpu.memory_space<vmem>>, %arg6: memref<1x128xf32, #tpu.memory_space<vmem>>, %arg7: memref<1x128xf32, #tpu.memory_space<vmem>>, %arg8: memref<1x128xf32, #tpu.memory_space<vmem>>, %arg9: memref<1x128xf32, #tpu.memory_space<vmem>>, %arg10: memref<1x128xf32, #tpu.memory_space<vmem>>, %arg11: memref<8x128xf32, #tpu.memory_space<vmem>>, %arg12: memref<8x128xf32, #tpu.memory_space<vmem>>) attributes {dimension_semantics = [#tpu.dimension_semantics<parallel>, #tpu.dimension_semantics<parallel>, #tpu.dimension_semantics<arbitrary>], iteration_bounds = array<i64: 1, 1, 1>, scalar_prefetch = 0 : i64, scratch_operands = 1 : i64, tpu.core_type = #tpu.core_type<tc>, window_params = [{transform_indices = @transform_0, window_bounds = array<i64: 8, 128>}, {transform_indices = @transform_1, window_bounds = array<i64: 128, 128>}, {transform_indices = @transform_2, window_bounds = array<i64: 128, 128>}, {transform_indices = @transform_3, window_bounds = array<i64: 1, 128>}, {transform_indices = @transform_4, window_bounds = array<i64: 1, 128>}, {transform_indices = @transform_5, window_bounds = array<i64: 1, 128>}, {transform_indices = @transform_6, window_bounds = array<i64: 1, 128>}, {transform_indices = @transform_7, window_bounds = array<i64: 1, 128>}, {transform_indices = @transform_8, window_bounds = array<i64: 8, 128>}]} {
    %c0_i32 = arith.constant 0 : i32
    %0 = arith.cmpi eq, %arg2, %c0_i32 : i32
    %1 = arith.extui %0 : i1 to i32
    %c0_i32_0 = arith.constant 0 : i32
    %2 = arith.cmpi ne, %1, %c0_i32_0 : i32
    scf.if %2 {
      %cst_17 = arith.constant 0.000000e+00 : f32
      %23 = vector.broadcast %cst_17 : f32 to vector<8x128xf32>
      %c0_18 = arith.constant 0 : index
      %c0_19 = arith.constant 0 : index
      %24 = vector.load %arg12[%c0_18, %c0_19] : memref<8x128xf32, #tpu.memory_space<vmem>>, vector<8x128xf32>
      tpu.vector_store %arg12[%c0_18, %c0_19], %23 {strides = array<i32>} : memref<8x128xf32, #tpu.memory_space<vmem>>, vector<8x128xf32>,
    } else {
    }
    %c0 = arith.constant 0 : index
    %c0_1 = arith.constant 0 : index
    %3 = vector.load %arg3[%c0, %c0_1] : memref<8x128xbf16, #tpu.memory_space<vmem>>, vector<8x128xbf16>
    %c0_2 = arith.constant 0 : index
    %c0_3 = arith.constant 0 : index
    %4 = vector.load %arg4[%c0_2, %c0_3] : memref<128x128xbf16, #tpu.memory_space<vmem>>, vector<128x128xbf16>
    %cst = arith.constant dense<0.000000e+00> : vector<8x128xf32>
    %5 = tpu.matmul %3, %4, %cst {dimension_numbers = #tpu.dot_dimension_numbers<[1], [1], [0], [0], [0, 0, 1, 0], [], []>} : vector<8x128xbf16>, vector<128x128xbf16>, vector<8x128xf32> -> vector<8x128xf32>
    %6 = arith.extf %3 : vector<8x128xbf16> to vector<8x128xf32>
    %c0_4 = arith.constant 0 : index
    %c0_5 = arith.constant 0 : index
    %7 = vector.load %arg6[%c0_4, %c0_5] : memref<1x128xf32, #tpu.memory_space<vmem>>, vector<1x128xf32>
    %8 = vector.broadcast %7 : vector<1x128xf32> to vector<8x128xf32>
    %9 = arith.mulf %6, %8 : vector<8x128xf32>
    %10 = arith.truncf %9 : vector<8x128xf32> to vector<8x128xbf16>
    %c0_6 = arith.constant 0 : index
    %c0_7 = arith.constant 0 : index
    %11 = vector.load %arg5[%c0_6, %c0_7] : memref<128x128xbf16, #tpu.memory_space<vmem>>, vector<128x128xbf16>
    %cst_8 = arith.constant dense<0.000000e+00> : vector<8x128xf32>
    %12 = tpu.matmul %10, %11, %cst_8 {dimension_numbers = #tpu.dot_dimension_numbers<[1], [1], [0], [0], [0, 0, 1, 0], [], []>} : vector<8x128xbf16>, vector<128x128xbf16>, vector<8x128xf32> -> vector<8x128xf32>
    %c0_9 = arith.constant 0 : index
    %c0_10 = arith.constant 0 : index
    %13 = vector.load %arg12[%c0_9, %c0_10] : memref<8x128xf32, #tpu.memory_space<vmem>>, vector<8x128xf32>
    %c0_11 = arith.constant 0 : index
    %c0_12 = arith.constant 0 : index
    %14 = vector.load %arg7[%c0_11, %c0_12] : memref<1x128xf32, #tpu.memory_space<vmem>>, vector<1x128xf32>
    %15 = vector.broadcast %14 : vector<1x128xf32> to vector<8x128xf32>
    %16 = arith.mulf %12, %15 : vector<8x128xf32>
    %17 = arith.addf %5, %16 : vector<8x128xf32>
    %18 = arith.addf %13, %17 : vector<8x128xf32>
    %c0_13 = arith.constant 0 : index
    %c0_14 = arith.constant 0 : index
    %19 = vector.load %arg12[%c0_13, %c0_14] : memref<8x128xf32, #tpu.memory_space<vmem>>, vector<8x128xf32>
    tpu.vector_store %arg12[%c0_13, %c0_14], %18 {strides = array<i32>} : memref<8x128xf32, #tpu.memory_space<vmem>>, vector<8x128xf32>,
    %c0_i32_15 = arith.constant 0 : i32
    %20 = arith.cmpi eq, %arg2, %c0_i32_15 : i32
    %21 = arith.extui %20 : i1 to i32
    %c0_i32_16 = arith.constant 0 : i32
    %22 = arith.cmpi ne, %21, %c0_i32_16 : i32
    scf.if %22 {
      %c0_17 = arith.constant 0 : index
      %c0_18 = arith.constant 0 : index
      %23 = vector.load %arg8[%c0_17, %c0_18] : memref<1x128xf32, #tpu.memory_space<vmem>>, vector<1x128xf32>
      %c0_19 = arith.constant 0 : index
      %c0_20 = arith.constant 0 : index
      %24 = vector.load %arg9[%c0_19, %c0_20] : memref<1x128xf32, #tpu.memory_space<vmem>>, vector<1x128xf32>
      %c0_21 = arith.constant 0 : index
      %c0_22 = arith.constant 0 : index
      %25 = vector.load %arg10[%c0_21, %c0_22] : memref<1x128xf32, #tpu.memory_space<vmem>>, vector<1x128xf32>
      %26 = arith.mulf %24, %25 : vector<1x128xf32>
      %27 = arith.addf %23, %26 : vector<1x128xf32>
      %c0_23 = arith.constant 0 : index
      %c0_24 = arith.constant 0 : index
      %28 = vector.load %arg12[%c0_23, %c0_24] : memref<8x128xf32, #tpu.memory_space<vmem>>, vector<8x128xf32>
      %29 = vector.broadcast %27 : vector<1x128xf32> to vector<8x128xf32>
      %30 = arith.addf %28, %29 : vector<8x128xf32>
      %c0_25 = arith.constant 0 : index
      %c0_26 = arith.constant 0 : index
      %31 = vector.load %arg11[%c0_25, %c0_26] : memref<8x128xf32, #tpu.memory_space<vmem>>, vector<8x128xf32>
      tpu.vector_store %arg11[%c0_25, %c0_26], %30 {strides = array<i32>} : memref<8x128xf32, #tpu.memory_space<vmem>>, vector<8x128xf32>,
    } else {
    }
    return
  }
  func.func @transform_0(%arg0: i32, %arg1: i32, %arg2: i32) -> (i32, i32) {
    %c0_i32 = arith.constant 0 : i32
    return %arg0, %arg2 : i32, i32
  }
  func.func @transform_1(%arg0: i32, %arg1: i32, %arg2: i32) -> (i32, i32) {
    %c0_i32 = arith.constant 0 : i32
    return %arg1, %arg2 : i32, i32
  }
  func.func @transform_2(%arg0: i32, %arg1: i32, %arg2: i32) -> (i32, i32) {
    %c0_i32 = arith.constant 0 : i32
    return %arg1, %arg2 : i32, i32
  }
  func.func @transform_3(%arg0: i32, %arg1: i32, %arg2: i32) -> (i32, i32) {
    %c0_i32 = arith.constant 0 : i32
    %c0_i32_0 = arith.constant 0 : i32
    return %c0_i32, %arg2 : i32, i32
  }
  func.func @transform_4(%arg0: i32, %arg1: i32, %arg2: i32) -> (i32, i32) {
    %c0_i32 = arith.constant 0 : i32
    %c0_i32_0 = arith.constant 0 : i32
    return %c0_i32, %arg1 : i32, i32
  }
  func.func @transform_5(%arg0: i32, %arg1: i32, %arg2: i32) -> (i32, i32) {
    %c0_i32 = arith.constant 0 : i32
    %c0_i32_0 = arith.constant 0 : i32
    return %c0_i32, %arg1 : i32, i32
  }
  func.func @transform_6(%arg0: i32, %arg1: i32, %arg2: i32) -> (i32, i32) {
    %c0_i32 = arith.constant 0 : i32
    %c0_i32_0 = arith.constant 0 : i32
    return %c0_i32, %arg1 : i32, i32
  }
  func.func @transform_7(%arg0: i32, %arg1: i32, %arg2: i32) -> (i32, i32) {
    %c0_i32 = arith.constant 0 : i32
    %c0_i32_0 = arith.constant 0 : i32
    return %c0_i32, %arg1 : i32, i32
  }
  func.func @transform_8(%arg0: i32, %arg1: i32, %arg2: i32) -> (i32, i32) {
    %c0_i32 = arith.constant 0 : i32
    return %arg0, %arg1 : i32, i32
  }
}

</mosaic_0001>

<bundles_post_ra>
// kernel: tpu_custom_call.1
= control target key start
LH: loop header
LB: loop body
LE: loop exit
PB: predicated region body
PF: predicated region fallthrough
CT: control target
= control target key end

     0   :  { %13 = vsyncpa [#allocation4], 0  ;;  %s550_s0 = inlined_call_operand.hbm [shape: bf16[8,128], index: 0, kind: input, shape index: {}]   ;;  %s551_s1 = inlined_call_operand.hbm [shape: bf16[128,128], index: 1, kind: input, shape index: {}]   ;;  %s552_s2 = inlined_call_operand.hbm [shape: bf16[128,128], index: 2, kind: input, shape index: {}]   ;;  %s553_s3 = inlined_call_operand.vmem [shape: f32[1,128], index: 3, kind: input, shape index: {}]   ;;  %s554_s4 = inlined_call_operand.vmem [shape: f32[1,128], index: 4, kind: input, shape index: {}]   ;;  %s555_s5 = inlined_call_operand.vmem [shape: f32[1,128], index: 5, kind: input, shape index: {}]   ;;  %s556_s6 = inlined_call_operand.vmem [shape: f32[1,128], index: 6, kind: input, shape index: {}]   ;;  %s557_s7 = inlined_call_operand.vmem [shape: f32[1,128], index: 7, kind: input, shape index: {}]   ;;  %s558_s8 = inlined_call_operand.hbm [shape: f32[8,128], index: 8, kind: output, shape index: {}]  }
   0x1   :  { %14 = vsyncpa [#allocation7], 0  ;;  %s31_s29 = sshll.u32 %s551_s1, 4  ;;  %s32_s29 = int_to_ptr.hbm [resolvable:$true] %s31_s29 }
   0x2   :  { %15 = vsyncpa [#allocation5], 0  ;;  %s472_s30 = smov [#allocation6]   ;;  %s21_s12 = sshll.u32 %s550_s0, 4  ;;  %s22_s12 = int_to_ptr.hbm [resolvable:$true] %s21_s12 }
   0x3   :  { %s33_s9 = sshll.u32 %s472_s30, 4  ;;  %s473_s13 = smov 64   ;;  %s34_s9 = int_to_ptr.vmem [resolvable:$true] %s33_s9 }
   0x4   :  { %s474_s14 = smov 4   ;;  %s475_s15 = smov [#allocation3]  }
   0x5   :  { %39 = dma.hbm_to_vmem [thread:$0]  %s32_s29, 1024, %s34_s9, [#allocation7], %s473_s13, %s473_s13, %s474_s14  }
   0x6   :  { %s23_s16 = sshll.u32 %s475_s15, 4  ;;  %s44_s19 = sshll.u32 %s552_s2, 4  ;;  %s24_s16 = int_to_ptr.vmem [resolvable:$true] %s23_s16  ;;  %s45_s19 = int_to_ptr.hbm [resolvable:$true] %s44_s19 }
   0x7   :  { %26 = dma.hbm_to_vmem [thread:$0]  %s22_s12, 64, %s24_s16, [#allocation4]  }
   0x8   :  { %s476_s1 = smov [#allocation8]  }
   0x9   :  { %s46_s20 = sshll.u32 %s476_s1, 4  ;;  %s47_s20 = int_to_ptr.vmem [resolvable:$true] %s46_s20 }
   0xa   :  { %52 = dma.hbm_to_vmem [thread:$0]  %s45_s19, 1024, %s47_s20, [#allocation7], %s473_s13, %s473_s13, %s474_s14  }
   0xb   :  { %466 = dma.done.wait [#allocation4], 64  }
   0xc   :  { %467 = vsyncadd [#allocation4], 4294967232 }
   0xd   :  { %468 = dma.done.wait [#allocation7], 2048  }
   0xe   :  { %469 = vsyncadd [#allocation7], 4294965248  ;;  %v361_v0 = vld [vmem:[#allocation8 + $0x38] sm:$0xff]  ;;  %v360_v2 = vld [vmem:[#allocation8 + $0x30] sm:$0xff]  ;;  %s477_s28 = smov [#allocation9]  }
   0xf   :  { %v353_v1 = vld [vmem:[#allocation6 + $0x38] sm:$0xff]  ;;  %168 = vmatpush.bf16.xpose.msra.mxu0 %v361_v0  ;;  %v352_v3 = vld [vmem:[#allocation6 + $0x30] sm:$0xff]  ;;  %v359_v4 = vld [vmem:[#allocation8 + $0x28] sm:$0xff] }
  0x10   :  { %235 = vmatpush.bf16.xpose.msra.mxu1 %v353_v1  ;;  %v351_v5 = vld [vmem:[#allocation6 + $0x28] sm:$0xff]  ;;  %v358_v6 = vld [vmem:[#allocation8 + $0x20] sm:$0xff]  ;;  %v357_v8 = vld [vmem:[#allocation8 + $0x18] sm:$0xff] }
  0x11   :  { %v350_v7 = vld [vmem:[#allocation6 + $0x20] sm:$0xff]  ;;  %v349_v9 = vld [vmem:[#allocation6 + $0x18] sm:$0xff]  ;;  %v356_v10 = vld [vmem:[#allocation8 + $0x10] sm:$0xff] }
  0x12   :  { %v348_v11 = vld [vmem:[#allocation6 + $0x10] sm:$0xff]  ;;  %v355_v12 = vld [vmem:[#allocation8 + $0x8] sm:$0xff]  ;;  %v80_v14 = vld [vmem:[#allocation3] sm:$0xf] }
  0x13   :  { %v347_v13 = vld [vmem:[#allocation6 + $0x8] sm:$0xff]  ;;  %v97_v15 = vunpack.c.l.bf16 %v80_v14  ;;  %v368_v16 = vld [vmem:[%s553_s3] ss:$0 sm:$0xff]  ;;  %v354_v17 = vld [vmem:[#allocation8] sm:$0xff] }
  0x14   :  { %v346_v18 = vld [vmem:[#allocation6] sm:$0xff]  ;;  %v254_v21 = vld [vmem:[%s556_s6] sm:$0x1]  ;;  %s269_s6 = sshll.u32 %s477_s28, 4  ;;  %s270_s6 = int_to_ptr.vmem [resolvable:$true] %s269_s6 }
  0x15   :  { %v102_v19 = vmul.f32 %v368_v16, %v97_v15  ;;  %v255_v22 = vld [vmem:[%s557_s7] sm:$0x1]  ;;  %s271_s7 = sshll.u32 %s558_s8, 4  ;;  %s272_s7 = int_to_ptr.hbm [resolvable:$true] %s271_s7 }
  0x16   :  { %v256_v23 = vmul.f32 %v255_v22, %v254_v21  ;;  %v253_v24 = vld [vmem:[%s555_s5] sm:$0x1] }
  0x17   :  { %169 = vmatpush.bf16.xpose.msra.mxu0 %v360_v2  ;;  %v103_v20 = vpack.c.bf16 %v102_v19, %v102_v19  ;;  %v369_v25 = vld [vmem:[%s554_s4] ss:$0 sm:$0xff] }
  0x18   :  { %236 = vmatpush.bf16.xpose.msra.mxu1 %v352_v3  ;;  %v257_v26 = vadd.f32 %v256_v23, %v253_v24 }
  0x1a   :  { %v260_v30 = vperm.slane %v257_v26, 0 }
  0x1f   :  { %170 = vmatpush.bf16.xpose.msra.mxu0 %v359_v4 }
  0x20   :  { %237 = vmatpush.bf16.xpose.msra.mxu1 %v351_v5 }
  0x27   :  { %171 = vmatpush.bf16.xpose.msra.mxu0 %v358_v6 }
  0x28   :  { %238 = vmatpush.bf16.xpose.msra.mxu1 %v350_v7 }
  0x2f   :  { %172 = vmatpush.bf16.xpose.msra.mxu0 %v357_v8 }
  0x30   :  { %239 = vmatpush.bf16.xpose.msra.mxu1 %v349_v9 }
  0x37   :  { %173 = vmatpush.bf16.xpose.msra.mxu0 %v356_v10 }
  0x38   :  { %240 = vmatpush.bf16.xpose.msra.mxu1 %v348_v11 }
  0x3f   :  { %174 = vmatpush.bf16.xpose.msra.mxu0 %v355_v12 }
  0x40   :  { %241 = vmatpush.bf16.xpose.msra.mxu1 %v347_v13 }
  0x47   :  { %175 = vmatpush.bf16.xpose.msra.mxu0 %v354_v17 }
  0x48   :  { %242 = vmatpush.bf16.xpose.msra.mxu1 %v346_v18 }
  0x4e   :  { %176 = vmatmul.bf16.vlgmr.msra.gmra.mxu0 %v103_v20 }
  0x4f   :  { %243 = vmatmul.bf16.vlgmr.msra.gmra.mxu1 %v80_v14 }
  0xcb   :  { %v177_v27 = vpop.f32.mrf.mxu0 }
  0xcc   :  { %v244_v28 = vpop.f32.mrf.mxu1  ;;  %v186_v29 = vmul.f32 %v369_v25, %v177_v27 }
  0xce   :  { %v245_v31 = vadd.f32 %v244_v28, %v186_v29 }
  0xd0   :  { %v262_v32 = vadd.f32 %v260_v30, %v245_v31 }
  0xd2   :  { %263 = vst [vmem:[#allocation9] sm:$0xff] %v262_v32 }
  0xd3   :  { %v179_v33 = vpop.f32.mrf.mxu0  ;;  %274 = dma.vmem_to_hbm [thread:$0]  %s270_s6, 128, %s272_s7, [#allocation5]  }
  0xd4   :  { %v246_v34 = vpop.f32.mrf.mxu1 }
  0xd5   :  { %470 = dma.done.wait [#allocation5], 128  }
  0xd6   :  { %471 = vsyncadd [#allocation5], 4294967168 }
  0xd7   :  { %279 = vsyncpa [#allocation4], 1 }
  0xd8   :  { %280 = vsyncpa [#allocation7], 1 }
  0xd9   :  { %281 = vsyncpa [#allocation5], 1 }

</bundles_post_ra>
